<compile_context>
chip_gen: v5e
topology: v5e:2x2
jax: 0.10.0
libtpu: 0.0.40
codegen_flags: <defaults>
</compile_context>

<pallas_src>
import jax
import jax.numpy as jnp
from jax import lax
from jax.experimental import pallas as pl
from jax.experimental.pallas import tpu as pltpu


_LN_EPS = 1e-12
_SQRT2 = 1.41421356237309504880


def _gelu_erf(x):
    # exact (erf-based) gelu, as used by BERT's ACT2FN["gelu"]
    return 0.5 * x * (1.0 + lax.erf(x / _SQRT2))


def _round_up(x, m):
    return ((x + m - 1) // m) * m


def _prediction_head_kernel(x_ref, wd_ref, bd_ref, gamma_ref, beta_ref,
                            wdec_ref, bdec_ref, out_ref, h_ref):
    """grid = (M tiles, V tiles); axis 1 (V) is the inner 'arbitrary' axis.

    The dense H->H matmul + gelu + LayerNorm runs once per M tile (guarded by
    program_id(1) == 0) into the bf16 VMEM scratch `h_ref`; every V tile then
    only performs the decoder matmul against the resident transform output.
    Padded rows of the last M tile may hold garbage (possibly NaN after
    erf/rsqrt) but are masked on writeback and never reduced across rows.
    """
    @pl.when(pl.program_id(1) == 0)
    def _compute_transform():
        # dense: bf16 x bf16 -> f32 accumulate on the MXU
        h = jnp.dot(x_ref[...], wd_ref[...],
                    preferred_element_type=jnp.float32) + bd_ref[...]
        h = _gelu_erf(h)
        # LayerNorm over the hidden axis, eps = 1e-12, statistics in f32
        mean = jnp.mean(h, axis=-1, keepdims=True)
        centered = h - mean
        var = jnp.mean(centered * centered, axis=-1, keepdims=True)
        inv = lax.rsqrt(var + _LN_EPS)
        # cache in bf16 once per M tile: avoids a per-V-tile f32 reload+cast
        # and halves the scratch footprint.
        h_ref[...] = (centered * inv * gamma_ref[...]
                      + beta_ref[...]).astype(h_ref.dtype)

    # decoder matmul: bf16 x bf16 -> f32 accumulate, add bias, store the
    # lane-dense [TM, TV] tile.
    y = jnp.dot(h_ref[...], wdec_ref[...], preferred_element_type=jnp.float32)
    out_ref[...] = (y + bdec_ref[...]).astype(out_ref.dtype)


def _estimate_vmem_bytes(TM, TV, H, out_bytes):
    """Rough per-step footprint: double-buffered pipelined blocks + resident
    constants + the bf16 transform scratch."""
    blocks = 2 * (TM * H * 2        # x tile (bf16)
                  + H * TV * 2      # decoder weight tile (bf16)
                  + TV * 4          # decoder bias tile
                  + TM * TV * out_bytes)
    consts = 2 * (H * H * 2 + 3 * H * 4)   # Wd (bf16) + bd/gamma/beta (f32)
    scratch = TM * H * 2                   # cached transform (bf16)
    return blocks + consts + scratch


def visual_pretraining_heads(sequence_output, pooled_output, params,
                             *, tm=512, tv=2048, out_dtype=jnp.float32):
    """Replicates VisualPreTrainingHeads.forward.

    sequence_output: [B, S, H] float32
    pooled_output:   [B, H]    float32
    Returns (prediction_scores [B, S, V], seq_relationship_score [B, 2]).
    """
    B, S, H = sequence_output.shape
    V = params["decoder_weight"].shape[1]
    M = B * S
    out_bytes = jnp.dtype(out_dtype).itemsize

    # Per-generation VMEM budget (64 MiB/TC on v7x, 128 MiB on v5e/v6e).
    try:
        vmem_cap = int(pltpu.get_tpu_info().vmem_capacity_bytes)
    except Exception:
        vmem_cap = 64 * 1024 * 1024
    budget = vmem_cap - (8 << 20)          # headroom for Mosaic internals

    # Tile sizes: TV lane-dense (multiple of 128), TM sublane-aligned
    # (multiple of 8) and at least H/2 so decoder-weight re-reads across the
    # M grid axis don't dominate HBM traffic.  Fall back to full-extent
    # blocks when the array is smaller than the preferred tile.
    TM = min(M, max(tm, _round_up(max(H // 2, 8), 8)))
    TV = tv if V >= tv else V
    # Shrink (keeping alignment) until the double-buffered footprint fits the
    # generation's VMEM budget (matters for big H on v7x's 64 MiB).
    while (_estimate_vmem_bytes(TM, TV, H, out_bytes) > budget
           and TV > 512 and TV % 256 == 0):
        TV //= 2
    while (_estimate_vmem_bytes(TM, TV, H, out_bytes) > budget
           and TM > 256 and TM % 16 == 0):
        TM //= 2
    grid = (pl.cdiv(M, TM), pl.cdiv(V, TV))

    # bf16 operands for the MXU (halves HBM traffic + VMEM per tile);
    # biases / LayerNorm affine parameters stay f32.  (Numerics deviation vs
    # the f32 PyTorch reference — accumulation stays f32.)
    x2d = sequence_output.reshape(M, H).astype(jnp.bfloat16)
    wd = params["dense_weight"].astype(jnp.bfloat16)
    wdec = params["decoder_weight"].astype(jnp.bfloat16)
    bd = params["dense_bias"].reshape(1, H).astype(jnp.float32)
    gamma = params["ln_gamma"].reshape(1, H).astype(jnp.float32)
    beta = params["ln_beta"].reshape(1, H).astype(jnp.float32)
    bdec = params["decoder_bias"].reshape(1, V).astype(jnp.float32)

    est = _estimate_vmem_bytes(TM, TV, H, out_bytes)
    vmem_limit = int(min(vmem_cap * 7 // 8, max(est * 5 // 4, 4 << 20)))

    cost = pl.CostEstimate(
        flops=2 * M * H * (H + V),
        transcendentals=M * H,                       # erf in the gelu (advisory)
        bytes_accessed=(M * H * 2 + H * H * 2 + H * V * 2 * grid[0]
                        + M * V * out_bytes + (3 * H + V) * 4),
    )

    grid_spec = pltpu.PrefetchScalarGridSpec(
        num_scalar_prefetch=0,
        grid=grid,
        in_specs=[
            pl.BlockSpec((TM, H), lambda i, j: (i, 0)),   # x tile (per M tile)
            pl.BlockSpec((H, H), lambda i, j: (0, 0)),    # dense weight (resident)
            pl.BlockSpec((1, H), lambda i, j: (0, 0)),    # dense bias (resident)
            pl.BlockSpec((1, H), lambda i, j: (0, 0)),    # LayerNorm gamma
            pl.BlockSpec((1, H), lambda i, j: (0, 0)),    # LayerNorm beta
            pl.BlockSpec((H, TV), lambda i, j: (0, j)),   # decoder weight tile
            pl.BlockSpec((1, TV), lambda i, j: (0, j)),   # decoder bias tile
        ],
        out_specs=pl.BlockSpec((TM, TV), lambda i, j: (i, j)),
        scratch_shapes=[pltpu.VMEM((TM, H), jnp.bfloat16)],  # cached transform h
    )

    # TODO(synk): on v7x (2 TCs/chip) use pltpu.CORE_PARALLEL on grid axis 0
    # (or pl.core_map over a tensorcore mesh) to shard the M axis across both
    # cores; kept as "parallel" here for portability across generations.
    pred2d = pl.pallas_call(
        _prediction_head_kernel,
        out_shape=jax.ShapeDtypeStruct((M, V), out_dtype),
        grid_spec=grid_spec,
        compiler_params=pltpu.CompilerParams(
            dimension_semantics=("parallel", "arbitrary"),
            vmem_limit_bytes=vmem_limit),
        cost_estimate=cost,
    )(x2d, wd, bd, gamma, beta, wdec, bdec)

    prediction_scores = pred2d.reshape(B, S, V)

    # seq_relationship: [B, H] @ [H, 2] is microscopic; a Pallas kernel with a
    # lane dim of 2 would be all masked stores, so leave it to plain XLA.
    seq_relationship_score = (pooled_output @ params["seq_rel_weight"]
                              + params["seq_rel_bias"])

    return prediction_scores, seq_relationship_score


def _reference(sequence_output, pooled_output, params):
    # Pure-JAX f32 reference for correctness checking.
    h = sequence_output @ params["dense_weight"] + params["dense_bias"]
    h = 0.5 * h * (1.0 + lax.erf(h / jnp.sqrt(2.0)))
    mean = jnp.mean(h, axis=-1, keepdims=True)
    var = jnp.mean((h - mean) ** 2, axis=-1, keepdims=True)
    h = (h - mean) / jnp.sqrt(var + _LN_EPS) * params["ln_gamma"] + params["ln_beta"]
    pred = h @ params["decoder_weight"] + params["decoder_bias"]
    seq = pooled_output @ params["seq_rel_weight"] + params["seq_rel_bias"]
    return pred, seq


if __name__ == "__main__":
    # Small shapes consistent with the module: batch=2, seq=16, hidden=32,
    # visual "vocab" (embedding weight second dim) = 256.  Passing
    # (tm, tv) = (16, 128) gives a real 2x2 grid even at these toy shapes so
    # the tiling / scratch-reuse path is actually exercised.
    B, S, H, V = 2, 16, 32, 256

    key = jax.random.PRNGKey(0)
    keys = jax.random.split(key, 10)

    sequence_output = jax.random.normal(keys[0], (B, S, H), dtype=jnp.float32)
    pooled_output = jax.random.normal(keys[1], (B, H), dtype=jnp.float32)

    params = {
        # VisualPredictionHeadTransform.dense : Linear(H, H)
        "dense_weight": jax.random.normal(keys[2], (H, H), jnp.float32) * 0.02,
        "dense_bias": jax.random.normal(keys[3], (H,), jnp.float32) * 0.02,
        # VisualPredictionHeadTransform.LayerNorm(H)
        "ln_gamma": jnp.ones((H,), jnp.float32)
                    + 0.01 * jax.random.normal(keys[4], (H,), jnp.float32),
        "ln_beta": 0.01 * jax.random.normal(keys[5], (H,), jnp.float32),
        # visual_model_embedding_weights: [H, V] ; decoder bias: zeros(V)
        "decoder_weight": jax.random.normal(keys[6], (H, V), jnp.float32) * 0.02,
        "decoder_bias": jnp.zeros((V,), jnp.float32),
        # seq_relationship : Linear(H, 2)
        "seq_rel_weight": jax.random.normal(keys[7], (H, 2), jnp.float32) * 0.02,
        "seq_rel_bias": jax.random.normal(keys[8], (2,), jnp.float32) * 0.02,
    }

    pred, seq_rel = visual_pretraining_heads(
        sequence_output, pooled_output, params, tm=16, tv=128)
    jax.block_until_ready(pred)
    jax.block_until_ready(seq_rel)

    # correctness check against pure-JAX f32 reference
    pred_ref, seq_ref = _reference(sequence_output, pooled_output, params)
    assert pred.shape == (B, S, V) and seq_rel.shape == (B, 2)
    # bf16 MXU operands (f32 accumulation) -> relaxed tolerance vs f32 ref
    assert jnp.allclose(pred, pred_ref, atol=2e-2, rtol=2e-2)
    assert jnp.allclose(seq_rel, seq_ref, atol=1e-5, rtol=1e-5)

    print("KERNEL_OK")
</pallas_src>

<mosaic_0001>
module attributes {stable_mosaic.version = 11 : i64} {
  func.func @_prediction_head_kernel(%arg0: i32, %arg1: i32, %arg2: memref<16x32xbf16, #tpu.memory_space<vmem>>, %arg3: memref<32x32xbf16, #tpu.memory_space<vmem>>, %arg4: memref<1x32xf32, #tpu.memory_space<vmem>>, %arg5: memref<1x32xf32, #tpu.memory_space<vmem>>, %arg6: memref<1x32xf32, #tpu.memory_space<vmem>>, %arg7: memref<32x128xbf16, #tpu.memory_space<vmem>>, %arg8: memref<1x128xf32, #tpu.memory_space<vmem>>, %arg9: memref<16x128xf32, #tpu.memory_space<vmem>>, %arg10: memref<16x32xbf16, #tpu.memory_space<vmem>>) attributes {dimension_semantics = [#tpu.dimension_semantics<parallel>, #tpu.dimension_semantics<arbitrary>], iteration_bounds = array<i64: 2, 2>, scalar_prefetch = 0 : i64, scratch_operands = 1 : i64, tpu.core_type = #tpu.core_type<tc>, window_params = [{transform_indices = @transform_0, window_bounds = array<i64: 16, 32>}, {pipeline_mode = #tpu.pipeline_mode<synchronous>, transform_indices = @transform_1, window_bounds = array<i64: 32, 32>}, {pipeline_mode = #tpu.pipeline_mode<synchronous>, transform_indices = @transform_2, window_bounds = array<i64: 1, 32>}, {pipeline_mode = #tpu.pipeline_mode<synchronous>, transform_indices = @transform_3, window_bounds = array<i64: 1, 32>}, {pipeline_mode = #tpu.pipeline_mode<synchronous>, transform_indices = @transform_4, window_bounds = array<i64: 1, 32>}, {transform_indices = @transform_5, window_bounds = array<i64: 32, 128>}, {transform_indices = @transform_6, window_bounds = array<i64: 1, 128>}, {transform_indices = @transform_7, window_bounds = array<i64: 16, 128>}]} {
    %c0_i32 = arith.constant 0 : i32
    %0 = arith.cmpi eq, %arg1, %c0_i32 : i32
    %1 = arith.extui %0 : i1 to i32
    %c0_i32_0 = arith.constant 0 : i32
    %2 = arith.cmpi ne, %1, %c0_i32_0 : i32
    scf.if %2 {
      %c0_8 = arith.constant 0 : index
      %c0_9 = arith.constant 0 : index
      %10 = vector.load %arg2[%c0_8, %c0_9] : memref<16x32xbf16, #tpu.memory_space<vmem>>, vector<16x32xbf16>
      %c0_10 = arith.constant 0 : index
      %c0_11 = arith.constant 0 : index
      %11 = vector.load %arg3[%c0_10, %c0_11] : memref<32x32xbf16, #tpu.memory_space<vmem>>, vector<32x32xbf16>
      %cst_12 = arith.constant dense<0.000000e+00> : vector<16x32xf32>
      %12 = tpu.matmul %10, %11, %cst_12 {dimension_numbers = #tpu.dot_dimension_numbers<[1], [0], [0], [1], [0, 0, 1, 1], [], []>} : vector<16x32xbf16>, vector<32x32xbf16>, vector<16x32xf32> -> vector<16x32xf32>
      %c0_13 = arith.constant 0 : index
      %c0_14 = arith.constant 0 : index
      %13 = vector.load %arg4[%c0_13, %c0_14] : memref<1x32xf32, #tpu.memory_space<vmem>>, vector<1x32xf32>
      %14 = vector.broadcast %13 : vector<1x32xf32> to vector<16x32xf32>
      %15 = arith.addf %12, %14 : vector<16x32xf32>
      %cst_15 = arith.constant 5.000000e-01 : f32
      %16 = vector.broadcast %cst_15 : f32 to vector<16x32xf32>
      %17 = arith.mulf %16, %15 : vector<16x32xf32>
      %cst_16 = arith.constant 1.41421354 : f32
      %18 = vector.broadcast %cst_16 : f32 to vector<16x32xf32>
      %19 = arith.divf %15, %18 : vector<16x32xf32>
      %20 = math.erf %19 : vector<16x32xf32>
      %cst_17 = arith.constant 1.000000e+00 : f32
      %21 = vector.broadcast %cst_17 : f32 to vector<16x32xf32>
      %22 = arith.addf %21, %20 : vector<16x32xf32>
      %23 = arith.mulf %17, %22 : vector<16x32xf32>
      %cst_18 = arith.constant dense<0.000000e+00> : vector<16xf32>
      %24 = vector.multi_reduction <add>, %23, %cst_18 [1] : vector<16x32xf32> to vector<16xf32>
      %25 = vector.shape_cast %24 : vector<16xf32> to vector<16x1xf32>
      %cst_19 = arith.constant 3.200000e+01 : f32
      %26 = vector.broadcast %cst_19 : f32 to vector<16x1xf32>
      %27 = arith.divf %25, %26 : vector<16x1xf32>
      %28 = vector.broadcast %27 : vector<16x1xf32> to vector<16x32xf32>
      %29 = arith.subf %23, %28 : vector<16x32xf32>
      %30 = arith.mulf %29, %29 : vector<16x32xf32>
      %cst_20 = arith.constant dense<0.000000e+00> : vector<16xf32>
      %31 = vector.multi_reduction <add>, %30, %cst_20 [1] : vector<16x32xf32> to vector<16xf32>
      %32 = vector.shape_cast %31 : vector<16xf32> to vector<16x1xf32>
      %cst_21 = arith.constant 3.200000e+01 : f32
      %33 = vector.broadcast %cst_21 : f32 to vector<16x1xf32>
      %34 = arith.divf %32, %33 : vector<16x1xf32>
      %cst_22 = arith.constant 9.99999996E-13 : f32
      %35 = vector.broadcast %cst_22 : f32 to vector<16x1xf32>
      %36 = arith.addf %34, %35 : vector<16x1xf32>
      %37 = math.rsqrt %36 : vector<16x1xf32>
      %38 = vector.broadcast %37 : vector<16x1xf32> to vector<16x32xf32>
      %39 = arith.mulf %29, %38 : vector<16x32xf32>
      %c0_23 = arith.constant 0 : index
      %c0_24 = arith.constant 0 : index
      %40 = vector.load %arg5[%c0_23, %c0_24] : memref<1x32xf32, #tpu.memory_space<vmem>>, vector<1x32xf32>
      %41 = vector.broadcast %40 : vector<1x32xf32> to vector<16x32xf32>
      %42 = arith.mulf %39, %41 : vector<16x32xf32>
      %c0_25 = arith.constant 0 : index
      %c0_26 = arith.constant 0 : index
      %43 = vector.load %arg6[%c0_25, %c0_26] : memref<1x32xf32, #tpu.memory_space<vmem>>, vector<1x32xf32>
      %44 = vector.broadcast %43 : vector<1x32xf32> to vector<16x32xf32>
      %45 = arith.addf %42, %44 : vector<16x32xf32>
      %46 = arith.truncf %45 : vector<16x32xf32> to vector<16x32xbf16>
      %c0_27 = arith.constant 0 : index
      %c0_28 = arith.constant 0 : index
      %47 = vector.load %arg10[%c0_27, %c0_28] : memref<16x32xbf16, #tpu.memory_space<vmem>>, vector<16x32xbf16>
      tpu.vector_store %arg10[%c0_27, %c0_28], %46 {strides = array<i32>} : memref<16x32xbf16, #tpu.memory_space<vmem>>, vector<16x32xbf16>,
    } else {
    }
    %c0 = arith.constant 0 : index
    %c0_1 = arith.constant 0 : index
    %3 = vector.load %arg10[%c0, %c0_1] : memref<16x32xbf16, #tpu.memory_space<vmem>>, vector<16x32xbf16>
    %c0_2 = arith.constant 0 : index
    %c0_3 = arith.constant 0 : index
    %4 = vector.load %arg7[%c0_2, %c0_3] : memref<32x128xbf16, #tpu.memory_space<vmem>>, vector<32x128xbf16>
    %cst = arith.constant dense<0.000000e+00> : vector<16x128xf32>
    %5 = tpu.matmul %3, %4, %cst {dimension_numbers = #tpu.dot_dimension_numbers<[1], [0], [0], [1], [0, 0, 1, 1], [], []>} : vector<16x32xbf16>, vector<32x128xbf16>, vector<16x128xf32> -> vector<16x128xf32>
    %c0_4 = arith.constant 0 : index
    %c0_5 = arith.constant 0 : index
    %6 = vector.load %arg8[%c0_4, %c0_5] : memref<1x128xf32, #tpu.memory_space<vmem>>, vector<1x128xf32>
    %7 = vector.broadcast %6 : vector<1x128xf32> to vector<16x128xf32>
    %8 = arith.addf %5, %7 : vector<16x128xf32>
    %c0_6 = arith.constant 0 : index
    %c0_7 = arith.constant 0 : index
    %9 = vector.load %arg9[%c0_6, %c0_7] : memref<16x128xf32, #tpu.memory_space<vmem>>, vector<16x128xf32>
    tpu.vector_store %arg9[%c0_6, %c0_7], %8 {strides = array<i32>} : memref<16x128xf32, #tpu.memory_space<vmem>>, vector<16x128xf32>,
    return
  }
  func.func @transform_0(%arg0: i32, %arg1: i32) -> (i32, i32) {
    %c0_i32 = arith.constant 0 : i32
    %c0_i32_0 = arith.constant 0 : i32
    return %arg0, %c0_i32 : i32, i32
  }
  func.func @transform_1(%arg0: i32, %arg1: i32) -> (i32, i32) {
    %c0_i32 = arith.constant 0 : i32
    %c0_i32_0 = arith.constant 0 : i32
    %c0_i32_1 = arith.constant 0 : i32
    return %c0_i32, %c0_i32_0 : i32, i32
  }
  func.func @transform_2(%arg0: i32, %arg1: i32) -> (i32, i32) {
    %c0_i32 = arith.constant 0 : i32
    %c0_i32_0 = arith.constant 0 : i32
    %c0_i32_1 = arith.constant 0 : i32
    return %c0_i32, %c0_i32_0 : i32, i32
  }
  func.func @transform_3(%arg0: i32, %arg1: i32) -> (i32, i32) {
    %c0_i32 = arith.constant 0 : i32
    %c0_i32_0 = arith.constant 0 : i32
    %c0_i32_1 = arith.constant 0 : i32
    return %c0_i32, %c0_i32_0 : i32, i32
  }
  func.func @transform_4(%arg0: i32, %arg1: i32) -> (i32, i32) {
    %c0_i32 = arith.constant 0 : i32
    %c0_i32_0 = arith.constant 0 : i32
    %c0_i32_1 = arith.constant 0 : i32
    return %c0_i32, %c0_i32_0 : i32, i32
  }
  func.func @transform_5(%arg0: i32, %arg1: i32) -> (i32, i32) {
    %c0_i32 = arith.constant 0 : i32
    %c0_i32_0 = arith.constant 0 : i32
    return %c0_i32, %arg1 : i32, i32
  }
  func.func @transform_6(%arg0: i32, %arg1: i32) -> (i32, i32) {
    %c0_i32 = arith.constant 0 : i32
    %c0_i32_0 = arith.constant 0 : i32
    return %c0_i32, %arg1 : i32, i32
  }
  func.func @transform_7(%arg0: i32, %arg1: i32) -> (i32, i32) {
    %c0_i32 = arith.constant 0 : i32
    return %arg0, %arg1 : i32, i32
  }
}

</mosaic_0001>

<bundles_post_ra>
// kernel: tpu_custom_call.1
= control target key start
LH: loop header
LB: loop body
LE: loop exit
PB: predicated region body
PF: predicated region fallthrough
CT: control target
= control target key end

     0   :  { %s1786_s0 = inlined_call_operand.hbm [shape: bf16[32,32], index: 0, kind: input, shape index: {}]   ;;  %s1787_s1 = inlined_call_operand.hbm [shape: bf16[32,32], index: 1, kind: input, shape index: {}]   ;;  %s1788_s2 = inlined_call_operand.vmem [shape: f32[1,32], index: 2, kind: input, shape index: {}]   ;;  %s1789_s3 = inlined_call_operand.hbm [shape: f32[1,32], index: 3, kind: input, shape index: {}]   ;;  %s1790_s4 = inlined_call_operand.hbm [shape: f32[1,32], index: 4, kind: input, shape index: {}]   ;;  %s1791_s5 = inlined_call_operand.hbm [shape: bf16[32,256], index: 5, kind: input, shape index: {}]   ;;  %s1792_s6 = inlined_call_operand.vmem [shape: f32[1,256], index: 6, kind: input, shape index: {}]   ;;  %s1793_s7 = inlined_call_operand.hbm [shape: f32[32,256], index: 7, kind: output, shape index: {}]  }
   0x1   :  { %1817 = sst [smem:[#allocation30_spill]] %s1786_s0 }
   0x2   :  { %1818 = sst [smem:[#allocation31_spill]] %s1787_s1 }
   0x3   :  { %1819 = sst [smem:[#allocation32_spill]] %s1788_s2 }
   0x4   :  { %1820 = sst [smem:[#allocation33_spill]] %s1789_s3 }
   0x5   :  { %1821 = sst [smem:[#allocation34_spill]] %s1790_s4 }
   0x6   :  { %1822 = sst [smem:[#allocation35_spill]] %s1792_s6 }
   0x7   :  { %1823 = sst [smem:[#allocation36_spill]] %s1793_s7 }
   0x8   :  { %12 = vsyncpa [#allocation4], 0 }
   0x9   :  { %14 = vsyncpa [#allocation4 + $0x1], 0 }
   0xa   :  { %15 = vsyncpa [#allocation7], 0 }
   0xb   :  { %16 = vsyncpa [#allocation10], 0 }
   0xc   :  { %17 = vsyncpa [#allocation5], 0 }
   0xd   :  { %19 = vsyncpa [#allocation5 + $0x1], 0  ;;  %s1444_s24 = smov 0   ;;  %s1446_s25 = smov 0  }
   0xe   :  { %s1448_s26 = smov 0   ;;  %s1450_s27 = smov 0  }
   0xf   :  { %s1452_s28 = smov 0   ;;  %s1454_s29 = smov 0  }
  0x10   :  { %s1456_s30 = smov 0   ;;  %s1458_s8 = smov 0  }
  0x11   :  { %s1460_s9 = smov 0   ;;  %s1462_s10 = smov 0  }
  0x12   :  { %s1464_s11 = smov 0   ;;  %s1466_s12 = smov 0  }
  0x13   :  { %s1468_s13 = smov 0   ;;  %s1470_s14 = smov 0  }
  0x14 LB: > { %1824 = sst [smem:[#allocation18_spill]] %s1339_s24  ;;  %s1513_s15 = sadd.s32 4294967295, %s1391_s14   ;;  %s1391_s14 = sphi %s1470_s14, %s25_s14   ;;  %s1387_s13 = sphi %s1468_s13, %s1883_s13   ;;  %s1383_s12 = sphi %s1466_s12, %s1882_s12   ;;  %s1379_s11 = sphi %s1464_s11, %s1881_s11   ;;  %s1375_s10 = sphi %s1462_s10, %s1880_s10   ;;  %s1371_s9 = sphi %s1460_s9, %s1879_s9   ;;  %s1367_s8 = sphi %s1458_s8, %s1878_s8   ;;  %s1363_s30 = sphi %s1456_s30, %s1870_s30   ;;  %s1359_s29 = sphi %s1454_s29, %s1877_s29   ;;  %s1355_s28 = sphi %s1452_s28, %s1876_s28   ;;  %s1351_s27 = sphi %s1450_s27, %s1875_s27   ;;  %s1347_s26 = sphi %s1448_s26, %s1874_s26   ;;  %s1343_s25 = sphi %s1446_s25, %s1873_s25   ;;  %s1339_s24 = sphi %s1444_s24, %s1869_s24  }
  0x15   : > { %1825 = sst [smem:[#allocation19_spill]] %s1343_s25  ;;  %s836_s16 = sadd.s32 4294967294, %s1391_s14  }
  0x16   : > { %1826 = sst [smem:[#allocation20_spill]] %s1367_s8  ;;  %p58_p0 = scmp.eq.s32.totalorder %s1513_s15, 0 }
  0x17   : > { %1827 = sst [smem:[#allocation21_spill]] %s1375_s10  ;;  %p167_p1 = scmp.ne.s32.totalorder %s1355_s28, %s1351_s27 }
  0x18   : > { %1828 = sst [smem:[#allocation22_spill]] %s1379_s11  ;;  %p218_p2 = scmp.ne.s32.totalorder %s1347_s26, %s1343_s25 }
  0x19   : > { %1829 = sst [smem:[#allocation23_spill]] %s1513_s15  ;;  %p219_p3 = scmp.eq.s32.totalorder %s1513_s15, 3 }
  0x1a   : > { %p1523_p4 = por %p167_p1, %p58_p0  ;;  %p224_p5 = scmp.ne.s32.totalorder %s1343_s25, %s1339_s24 }
  0x1b   : > { %p1529_p6 = por %p219_p3, %p218_p2  ;;  %p225_p7 = scmp.eq.s32.totalorder %s836_s16, 3 }
  0x1c   : > { %s1830_s17 = scalar_select %p1523_p4, 1, 0 }
  0x1d   : > { %s1832_s18 = scalar_select %p1529_p6, 1, 0 }
  0x1e   : > { %1831 = sst [smem:[#allocation24_spill]] %s1830_s17  ;;  %p837_p8 = scmp.ge.s32.totalorder %s1391_s14, 1 }
  0x1f   : > { %1833 = sst [smem:[#allocation25_spill]] %s1832_s18  ;;  %p232_p9 = scmp.lt.s32.totalorder %s1391_s14, 5 }
  0x20   : > { %p1535_p10 = por %p225_p7, %p224_p5  ;;  %s1837_s1 = sld [smem:[#allocation31_spill]] }
  0x21   : > { %p1539_p11 = pnand %p837_p8, %p232_p9  ;;  %s1393_s27 = smov [#allocation6]  }
  0x22   : > { %s1834_s19 = scalar_select %p1535_p10, 1, 0 }
  0x23   : > { %p915_p12 = pneg %p1539_p11  ;;  %s245_s16 = sshll.u32 %s1393_s27, 4  ;;  %s246_s16 = int_to_ptr.vmem [resolvable:$true] %s245_s16 }
  0x24   : > { %1835 = sst [smem:[#allocation26_spill]] %s1834_s19  ;;  %s1797_s21 = smov 64  }
  0x25   : > { %p1550_p13 = pnand %p915_p12, %p58_p0  ;;  %s1799_s22 = smov 4  }
  0x26   : > { %s243_s23 = sshll.u32 %s1837_s1, 4  ;;  %s34_s1 = sadd.s32 1, %s1383_s12  ;;  %s244_s23 = int_to_ptr.hbm [resolvable:$true] %s243_s23 }
  0x27   : > { %918 = dma.hbm_to_vmem [thread:$0]  (!%p1550_p13), %s244_s23, 256, %s246_s16, [#allocation7], %s1797_s21, %s1797_s21, %s1799_s22  }
  0x28   : > { %s37_s27 = sadd.s32 1, %s1387_s13  ;;  %p35_p1 = scmp.ge.s32.totalorder %s34_s1, 2 }
  0x29   : > { %s44_s24 = sadd.s32 1, %s1371_s9  ;;  %p51_p2 = scmp.ne.s32.totalorder %s1371_s9, %s1367_s8 }
  0x2a   : > { %p1802_p3 = scmp.eq.s32.totalorder %s1391_s14, 0  ;;  %s1885_s1 = smov (%p35_p1, %s34_s1), 0 }
  0x2b   : > { %1839 = sst [smem:[#allocation27_spill]] %s1885_s1  ;;  %s1887_s27 = smov (!%p35_p1, %s37_s27), %s1387_s13 }
  0x2c   : > { %p1570_p5 = por %p1802_p3, %p51_p2  ;;  %p57_p7 = scmp.ne.s32.totalorder %s1367_s8, %s1363_s30 }
  0x2d   : > { %p39_p8 = scmp.ge.s32.totalorder %s1887_s27, 2  ;;  %s1578_s23 = ssub.s32 %s1383_s12, %s1885_s1 }
  0x2e   : > { %p1582_p9 = por %p58_p0, %p57_p7  ;;  %p152_p12 = scmp.eq.s32.totalorder %s1578_s23, 0 }
  0x2f   : > { %s1889_s27 = smov (%p39_p8, %s1887_s27), 0  ;;  %s208_s21 = sadd.s32 1, %s1347_s26 }
  0x30   : > { %s1841_s16 = scalar_select %p1582_p9, 1, 0 }
  0x31   : > { %1843 = sst [smem:[#allocation29_spill]] %s1889_s27  ;;  %p939_p1 = scmp.lt.s32.totalorder %s1391_s14, 4 }
  0x32   : > { %1842 = sst [smem:[#allocation28_spill]] %s1841_s16  ;;  %s41_s22 = ssub.s32 %s1387_s13, %s1889_s27 }
  0x33   : > { %s286_s30 = sand.u32 1, %s1391_s14   ;;  %p42_p2 = scmp.eq.s32.totalorder %s41_s22, 0 }
  0x34   : > { %s205_s1 = sor.u32 %s1578_s23, %s41_s22  ;;  %s288_s2 = sand.u32 1, %s1371_s9  }
  0x35   : > { %p206_p3 = scmp.eq.s32.totalorder %s205_s1, 0  ;;  %s889_s6 = sshll.u32 %s1387_s13, 3 }
  0x36   : > { %s1596_s18 = scalar_select %p42_p2, %s1371_s9, %s44_s24  }
  0x37   : > { %s1599_s11 = scalar_select %p206_p3, %s1347_s26, %s208_s21  }
  0x38   : > { %s842_s10 = sshll.u32 %s288_s2, 3  ;;  %s1844_s0 = sld [smem:[#allocation30_spill]] }
  0x39   : > { %s290_s27 = scalar_lea.vmem [#allocation3], %s842_s10  ;;  %p926_p7 = pnand %p939_p1, %p1570_p5 }
  0x3a   : > { %s298_s15 = sshll.u32 %s290_s27, 4  ;;  %s1845_s3 = sld [smem:[#allocation33_spill]]  ;;  %s299_s15 = int_to_ptr.vmem [resolvable:$true] %s298_s15 }
  0x3b   : > { %s1846_s25 = smov 4   ;;  %s1847_s10 = smov 64  }
  0x3c   : > { %s1396_s7 = smov [#allocation8]   ;;  %s1848_s4 = sld [smem:[#allocation34_spill]] }
  0x3d   : > { %s263_s17 = sshll.u32 %s1396_s7, 4  ;;  %s154_s1 = sadd.s32 1, %s1359_s29  ;;  %s264_s17 = int_to_ptr.vmem [resolvable:$true] %s263_s17 }
  0x3e   : > { %s295_s16 = scalar_lea.hbm %s1844_s0, %s889_s6  ;;  %s1613_s6 = scalar_lea.sflag [#allocation4], %s286_s30 }
  0x3f   : > { %s296_s8 = sshll.u32 %s295_s16, 4  ;;  %s1397_s16 = smov [#allocation9]   ;;  %s297_s8 = int_to_ptr.hbm [resolvable:$true] %s296_s8 }
  0x40   : > { %s261_s2 = sshll.u32 %s1845_s3, 4  ;;  %s275_s30 = sshll.u32 %s1397_s16, 4  ;;  %s262_s2 = int_to_ptr.hbm [resolvable:$true] %s261_s2  ;;  %s276_s30 = int_to_ptr.vmem [resolvable:$true] %s275_s30 }
  0x41   : > { %928 = dma.hbm_to_vmem [thread:$0]  (!%p926_p7), %s297_s8, 128, %s299_s15, %s1613_s6, %s1847_s10, %s1847_s10, %s1846_s25  }
  0x42   : > { %s273_s27 = sshll.u32 %s1848_s4, 4  ;;  %p161_p3 = scmp.ne.s32.totalorder %s1359_s29, %s1355_s28  ;;  %s274_s27 = int_to_ptr.hbm [resolvable:$true] %s273_s27 }
  0x43   : > { %921 = dma.hbm_to_vmem [thread:$0]  (!%p1550_p13), %s262_s2, 16, %s264_s17, [#allocation7]  }
  0x44   : > { %924 = dma.hbm_to_vmem [thread:$0]  (!%p1550_p13), %s274_s27, 16, %s276_s30, [#allocation10]  }
  0x45   : > { %s1630_s8 = scalar_select %p152_p12, %s1359_s29, %s154_s1  }
  0x46   : > { %s310_s15 = sand.u32 1, %s1359_s29   ;;  %s846_s7 = sshll.u32 %s1383_s12, 2 }
  0x47   : > { %s845_s24 = sshll.u32 %s310_s15, 4  ;;  %p1849_p5 = scmp.eq.s32.totalorder %s1391_s14, 0 }
  0x48   : > { %s316_s2 = scalar_lea.hbm %s1791_s5, %s846_s7  ;;  %s312_s17 = scalar_lea.vmem [#allocation11], %s845_s24 }
  0x49   : > { %p163_p8 = por %p161_p3, %p1849_p5  ;;  %s319_s16 = sshll.u32 %s312_s17, 4  ;;  %s320_s16 = int_to_ptr.vmem [resolvable:$true] %s319_s16 }
  0x4a   : > { %s317_s0 = sshll.u32 %s316_s2, 4  ;;  %s1398_s19 = smov 128   ;;  %s318_s0 = int_to_ptr.hbm [resolvable:$true] %s317_s0 }
  0x4b   : > { %p929_p13 = pnand %p939_p1, %p163_p8  ;;  %337 = sbr.rel (%p1539_p11) target bundleno = 726 (0x2d6), region = 48 }
  0x4c   : > { %s1850_s23 = sld [smem:[#allocation23_spill]] (!%p1539_p11) }
  0x4d   : > { %931 = dma.hbm_to_vmem [thread:$0]  (!%p929_p13), %s318_s0, 256, %s320_s16, %s1613_s6, %s1398_s19, %s1847_s10, %s1846_s25  }
  0x4e   : > { %s1851_s27 = sld [smem:[#allocation20_spill]] (!%p1539_p11) }
  0x52   : > { %s339_s1 = sand.u32 1, %s1850_s23  }
  0x53   : > { %s340_s24 = scalar_lea.sflag [#allocation4], %s339_s1 }
  0x54   : > { %s341_s15 = sand.u32 1, %s1851_s27  }
  0x55   : > { %s848_s7 = sshll.u32 %s341_s15, 3 }
  0x56   : > { %s343_s21 = scalar_lea.vmem [#allocation3], %s848_s7 }
  0x57   : > { %1318 = dma.done.wait (%p1582_p9), %s340_s24, 128  }
  0x58   : > { %1320 = vsyncadd (%p1582_p9), %s340_s24, 4294967168 }
  0x59   : > { %1322 = dma.done.wait (%p58_p0), [#allocation7], 272  }
  0x5a   : > { %1324 = vsyncadd (%p58_p0), [#allocation7], 4294967024 }
  0x5b   : > { %1326 = dma.done.wait (%p58_p0), [#allocation10], 16  }
  0x5c   : > { %1328 = vsyncadd (%p58_p0), [#allocation10], 4294967280  ;;  %s366_s20 = sand.u32 1, %s1355_s28  }
  0x5d   : > { %s1663_s6 = sshll.u32 %s366_s20, 4 }
  0x5e   : > { %s368_s25 = scalar_lea.vmem [#allocation11], %s1663_s6 }
  0x5f   : > { %1330 = dma.done.wait (%p1523_p4), %s340_s24, 256  }
  0x60   : > { %1332 = vsyncadd (%p1523_p4), %s340_s24, 4294967040  ;;  %s1854_s10 = sld [smem:[#allocation19_spill]] }
  0x61   : > { %s1855_s22 = sld [smem:[#allocation21_spill]] }
  0x62   : > { %s1856_s27 = sld [smem:[#allocation35_spill]] }
  0x66   : > { %s1816_s2 = sand.u32 1, %s1854_s10  }
  0x67   : > { %p409_p11 = scmp.lt.s32.totalorder %s1855_s22, 1  ;;  %s853_s17 = sshll.u32 %s1816_s2, 4 }
  0x68   : > { %s1681_s1 = scalar_lea.vmem [#allocation12], %s853_s17  ;;  %p854_p0 = scmp.ne.s32.totalorder %s1855_s22, 0 }
  0x69   : > { %s1675_s16 = scalar_select %p409_p11, %s1855_s22, 1 }
  0x6a   : > { %417 = sbr.rel (%p854_p0) target bundleno = 577 (0x241), region = 72  ;;  %s1857_s24 = sld [smem:[#allocation32_spill]] (!%p854_p0) }
  0x6b   : > { %s411_s30 = scalar_lea.vmem %s1856_s27, %s1675_s16 }
  0x6f   : > { %v892_v0 = vld [vmem:[#allocation6 + $0x8] sm:$0xff]  ;;  %v891_v1 = vld [vmem:[#allocation6] sm:$0xff]  ;;  %v890_v2 = vld [vmem:[%s343_s21] sm:$0xff]  ;;  %vm445_vm0 = vcmask 261120   ;;  %v1399_v3 = vmov 1.4142135  }
  0x70   : > { %455 = vmatpush.bf16.msra.mxu0 %v892_v0  ;;  %1070 = vrcp.f32 %v1399_v3  ;;  %v1067_v9 = vld [vmem:[%s1857_s24] ss:$0 sm:$0xff]  ;;  %vm623_vm15 = vcmask 257024  }
  0x74   : > { %456 = vmatpush.bf16.msra.mxu0 %v891_v1 }
  0x76   : > { %v1071_v4 = vpop.eup %1070 }
  0x77   : > { %867 = vmatmul.msk.bf16.vlgmr.msra.gmra.mxu0 %vm445_vm0, %v890_v2  ;;  %v466_v5 = vmul.f32 1.4142135, %v1071_v4  ;;  %vm470_vm1 = vweird.f32 %v1071_v4 }
  0x79   : > { %v467_v6 = vsub.f32 1.0, %v466_v5 }
  0x7b   : > { %v468_v7 = vmul.f32 %v1071_v4, %v467_v6 }
  0x7d   : > { %v469_v8 = vadd.f32 %v1071_v4, %v468_v7 }
  0x7f   : > { %v471_v11 = vsel %vm470_vm1, %v1071_v4, %v469_v8 }
  0xf4   : > { %v458_v10 = vpop.f32.mrf.mxu0 }
  0xf5   : > { %v1688_v12 = vadd.f32 %v1067_v9, %v458_v10 }
  0xf7   : > { %v472_v13 = vmul.f32 %v471_v11, %v1688_v12 }
  0xf9   : > { %v474_v14 = vmul.f32 %v472_v13, %v472_v13 }
  0xfb   : > { %v475_v15 = vmin.f32 %v474_v14, 16.0 }
  0xfc   : > { %v460_v16 = vpop.f32.mrf.mxu0 }
  0xfd   : > { %v476_v17 = vmul.f32 2.1237322e-06, %v475_v15  ;;  %v1691_v18 = vadd.f32 %v1067_v9, %v460_v16  ;;  %v487_v19 = vmul.f32 3.8918573e-05, %v475_v15 }
  0xff   : > { %v477_v20 = vadd.f32 0.00028619796, %v476_v17  ;;  %v1694_v21 = vmul.f32 %v471_v11, %v1691_v18  ;;  %v488_v22 = vadd.f32 0.001143296, %v487_v19  ;;  %v463_v19 = vmul.f32 0.5, %v1688_v12 }
 0x101   : > { %v478_v23 = vmul.f32 %v477_v20, %v475_v15  ;;  %v514_v24 = vmul.f32 %v1694_v21, %v1694_v21  ;;  %v489_v25 = vmul.f32 %v488_v22, %v475_v15 }
 0x103   : > { %v515_v26 = vmin.f32 %v514_v24, 16.0  ;;  %v490_v27 = vadd.f32 0.014752088, %v489_v25  ;;  %v479_v28 = vadd.f32 0.0036580483, %v478_v23 }
 0x105   : > { %v516_v29 = vmul.f32 2.1237322e-06, %v515_v26  ;;  %v491_v30 = vmul.f32 %v490_v27, %v475_v15  ;;  %v527_v31 = vmul.f32 3.8918573e-05, %v515_v26  ;;  %v480_v34 = vmul.f32 %v479_v28, %v475_v15 }
 0x107   : > { %v517_v32 = vadd.f32 0.00028619796, %v516_v29  ;;  %v492_v33 = vadd.f32 0.112945676, %v491_v30  ;;  %v528_v35 = vadd.f32 0.001143296, %v527_v31 }
 0x108   : > { %v481_v40 = vadd.f32 0.05243302, %v480_v34  ;;  %v464_v30 = vmul.f32 0.5, %v1691_v18 }
 0x109   : > { %v518_v36 = vmul.f32 %v517_v32, %v515_v26  ;;  %v493_v37 = vmul.f32 %v492_v33, %v475_v15  ;;  %v529_v38 = vmul.f32 %v528_v35, %v515_v26  ;;  %v1400_v33 = vmov 32.0  }
 0x10a   : > { %v482_v46 = vmul.f32 %v481_v40, %v475_v15 }
 0x10b   : > { %v494_v39 = vadd.f32 0.4994258, %v493_v37  ;;  %v530_v41 = vadd.f32 0.014752088, %v529_v38  ;;  %v519_v42 = vadd.f32 0.0036580483, %v518_v36 }
 0x10c   : > { %v483_v50 = vadd.f32 0.18741608, %v482_v46 }
 0x10d   : > { %v495_v43 = vmul.f32 %v494_v39, %v475_v15  ;;  %v531_v44 = vmul.f32 %v530_v41, %v515_v26  ;;  %v520_v48 = vmul.f32 %v519_v42, %v515_v26 }
 0x10e   : > { %v484_v55 = vmul.f32 %v483_v50, %v475_v15 }
 0x10f   : > { %v496_v45 = vadd.f32 1.0, %v495_v43  ;;  %v532_v47 = vadd.f32 0.112945676, %v531_v44  ;;  %v521_v52 = vadd.f32 0.05243302, %v520_v48 }
 0x110   : > { %v485_v61 = vadd.f32 1.1283791, %v484_v55 }
 0x111   : > { %1072 = vrcp.f32 %v496_v45  ;;  %v533_v49 = vmul.f32 %v532_v47, %v515_v26  ;;  %v522_v58 = vmul.f32 %v521_v52, %v515_v26  ;;  %v508_v60 = vand.u32 2147483648, %v496_v45 }
 0x112   : > { %v506_v63 = vand.u32 2147483647, %v496_v45  ;;  %vm502_vm3 = vweird.f32 %v496_v45  ;;  %v486_v4 = vmul.f32 %v485_v61, %v472_v13  ;;  %v1068_v61 = vld [vmem:[#allocation8] ss:$0 sm:$0xff] }
 0x113   : > { %v534_v51 = vadd.f32 0.4994258, %v533_v49  ;;  %v523_v0 = vadd.f32 0.18741608, %v522_v58  ;;  %v509_v2 = vor.u32 1.1754944e-38, %v508_v60 }
 0x114   : > { %vm507_vm5 = vcmp.eq.f32.partialorder %v506_v63, 8.507059e+37 }
 0x115   : > { %v535_v53 = vmul.f32 %v534_v51, %v515_v26  ;;  %v524_v6 = vmul.f32 %v523_v0, %v515_v26  ;;  %v1069_v0 = vld [vmem:[#allocation9] ss:$0 sm:$0xff] }
 0x117   : > { %v1073_v54 = vpop.eup %1072  ;;  %v536_v57 = vadd.f32 1.0, %v535_v53  ;;  %v525_v15 = vadd.f32 1.1283791, %v524_v6 }
 0x118   : > { %v498_v56 = vmul.f32 %v1073_v54, %v496_v45  ;;  %vm503_vm2 = vweird.f32 %v1073_v54 }
 0x119   : > { %1074 = vrcp.f32 %v536_v57  ;;  %vm504_vm4 = vmor %vm502_vm3, %vm503_vm2  ;;  %v548_v14 = vand.u32 2147483648, %v536_v57  ;;  %v546_v17 = vand.u32 2147483647, %v536_v57  ;;  %vm542_vm7 = vweird.f32 %v536_v57 }
 0x11a   : > { %v499_v59 = vsub.f32 1.0, %v498_v56  ;;  %v526_v24 = vmul.f32 %v525_v15, %v1694_v21  ;;  %1076 = vrcp.f32 %v1400_v33 }
 0x11b   : > { %v549_v13 = vor.u32 1.1754944e-38, %v548_v14  ;;  %vm547_vm9 = vcmp.eq.f32.partialorder %v546_v17, 8.507059e+37 }
 0x11c   : > { %v500_v62 = vmul.f32 %v1073_v54, %v499_v59 }
 0x11e   : > { %v501_v1 = vadd.f32 %v1073_v54, %v500_v62 }
 0x11f   : > { %v1075_v3 = vpop.eup %1074 }
 0x120   : > { %v505_v5 = vsel %vm504_vm4, %v1073_v54, %v501_v1  ;;  %v538_v8 = vmul.f32 %v1075_v3, %v536_v57  ;;  %vm543_vm6 = vweird.f32 %v1075_v3  ;;  %v1077_v34 = vpop.eup %1076 }
 0x121   : > { %v510_v7 = vsel %vm507_vm5, %v509_v2, %v505_v5  ;;  %vm544_vm8 = vmor %vm542_vm7, %vm543_vm6  ;;  %v565_v35 = vmul.f32 32.0, %v1077_v34  ;;  %vm569_vm10 = vweird.f32 %v1077_v34 }
 0x122   : > { %v511_v9 = vmul.f32 %v510_v7, %v486_v4  ;;  %v539_v10 = vsub.f32 1.0, %v538_v8 }
 0x123   : > { %v566_v21 = vsub.f32 1.0, %v565_v35 }
 0x124   : > { %v868_v11 = vclamps-f32 %v511_v9, 1.0  ;;  %v540_v16 = vmul.f32 %v1075_v3, %v539_v10 }
 0x125   : > { %v567_v36 = vmul.f32 %v1077_v34, %v566_v21 }
 0x126   : > { %v554_v20 = vadd.f32 1.0, %v868_v11  ;;  %v541_v22 = vadd.f32 %v1075_v3, %v540_v16 }
 0x127   : > { %v568_v37 = vadd.f32 %v1077_v34, %v567_v36 }
 0x128   : > { %v556_v23 = vmul.f32 %v554_v20, %v463_v19  ;;  %v545_v25 = vsel %vm544_vm8, %v1075_v3, %v541_v22 }
 0x129   : > { %v550_v27 = vsel %vm547_vm9, %v549_v13, %v545_v25  ;;  %v570_v38 = vsel %vm569_vm10, %v1077_v34, %v568_v37 }
 0x12a   : > { %v558_v26 = vsel %vm445_vm0, %v556_v23, 0.0  ;;  %v551_v28 = vmul.f32 %v550_v27, %v526_v24 }
 0x12b   : > { %559 = vadd.xlane.f32.xlu0 %v558_v26 }
 0x12c   : > { %v869_v29 = vclamps-f32 %v551_v28, 1.0 }
 0x12e   : > { %v555_v31 = vadd.f32 1.0, %v869_v29 }
 0x130   : > { %v557_v12 = vmul.f32 %v555_v31, %v464_v30 }
 0x132   : > { %v561_v32 = vsel %vm445_vm0, %v557_v12, 0.0 }
 0x133   : > { %562 = vadd.xlane.f32.xlu0 %v561_v32 }
 0x19e   : > { %v560_v39 = vpop.xlane.xlu0 %559 }
 0x19f   : > { %v571_v40 = vmul.f32 %v570_v38, %v560_v39 }
 0x1a1   : > { %v573_v41 = vsub.f32 %v556_v23, %v571_v40 }
 0x1a3   : > { %v575_v42 = vmul.f32 %v573_v41, %v573_v41 }
 0x1a5   : > { %v577_v18 = vsel %vm445_vm0, %v575_v42, 0.0 }
 0x1a6   : > { %578 = vadd.xlane.f32.xlu1 %v577_v18  ;;  %v563_v43 = vpop.xlane.xlu0 %562 }
 0x1a7   : > { %v572_v44 = vmul.f32 %v570_v38, %v563_v43 }
 0x1a9   : > { %v574_v45 = vsub.f32 %v557_v12, %v572_v44 }
 0x1ab   : > { %v576_v46 = vmul.f32 %v574_v45, %v574_v45 }
 0x1ad   : > { %v580_v47 = vsel %vm445_vm0, %v576_v46, 0.0 }
 0x1ae   : > { %581 = vadd.xlane.f32.xlu1 %v580_v47 }
 0x219   : > { %v579_v48 = vpop.xlane.xlu1 %578 }
 0x21a   : > { %v583_v49 = vmul.f32 %v579_v48, %v570_v38 }
 0x21c   : > { %v585_v50 = vadd.f32 1e-12, %v583_v49 }
 0x21e   : > { %1078 = vrsqrt.f32 %v585_v50  ;;  %vm593_vm12 = vweird.f32 %v585_v50 }
 0x221   : > { %v582_v51 = vpop.xlane.xlu1 %581 }
 0x222   : > { %v584_v52 = vmul.f32 %v582_v51, %v570_v38 }
 0x224   : > { %v1079_v53 = vpop.eup %1078  ;;  %v586_v55 = vadd.f32 1e-12, %v584_v52 }
 0x225   : > { %v588_v54 = vmul.f32 %v1079_v53, %v585_v50  ;;  %vm594_vm11 = vweird.f32 %v1079_v53 }
 0x226   : > { %1080 = vrsqrt.f32 %v586_v55  ;;  %vm595_vm13 = vmor %vm593_vm12, %vm594_vm11  ;;  %vm603_vm0 = vweird.f32 %v586_v55 }
 0x227   : > { %v589_v56 = vmul.f32 %v1079_v53, %v588_v54 }
 0x229   : > { %v590_v57 = vmul.f32 0.5, %v589_v56 }
 0x22b   : > { %v591_v58 = vsub.f32 1.5, %v590_v57 }
 0x22c   : > { %v1081_v59 = vpop.eup %1080 }
 0x22d   : > { %v592_v60 = vmul.f32 %v1079_v53, %v591_v58  ;;  %v598_v62 = vmul.f32 %v1081_v59, %v586_v55  ;;  %vm604_vm14 = vweird.f32 %v1081_v59 }
 0x22e   : > { %vm605_vm1 = vmor %vm603_vm0, %vm604_vm14 }
 0x22f   : > { %v596_v63 = vsel %vm595_vm13, %v1079_v53, %v592_v60  ;;  %v599_v2 = vmul.f32 %v1081_v59, %v598_v62 }
 0x230   : > { %v607_v1 = vmul.f32 %v596_v63, %v573_v41 }
 0x231   : > { %v600_v4 = vmul.f32 0.5, %v599_v2 }
 0x232   : > { %v613_v3 = vmul.f32 %v1068_v61, %v607_v1 }
 0x233   : > { %v601_v6 = vsub.f32 1.5, %v600_v4 }
 0x234   : > { %v619_v5 = vadd.f32 %v1069_v0, %v613_v3 }
 0x235   : > { %v602_v8 = vmul.f32 %v1081_v59, %v601_v6 }
 0x236   : > { %v621_v7 = vpack.c.bf16 %v619_v5, %v619_v5 }
 0x237   : > { %v606_v9 = vsel %vm605_vm1, %v1081_v59, %v602_v8 }
 0x238   : > { %624 = vst.msk [vmem:[#allocation2] sm:$0xf] %vm623_vm15, %v621_v7  ;;  %v608_v10 = vmul.f32 %v606_v9, %v574_v45 }
 0x23a   : > { %v614_v11 = vmul.f32 %v1068_v61, %v608_v10 }
 0x23c   : > { %v620_v14 = vadd.f32 %v1069_v0, %v614_v11 }
 0x23e   : > { %v622_v15 = vpack.c.bf16 %v620_v14, %v620_v14 }
 0x240   : > { %625 = vst.msk [vmem:[#allocation2 + $0x4] sm:$0xf] %vm623_vm15, %v622_v15 }
 0x241 PF: > { %s1858_s21 = sld [smem:[#allocation22_spill]]  ;;  %v895_v16 = vld [vmem:[%s368_s25 + $0x8] sm:$0xff]  ;;  %v894_v17 = vld [vmem:[%s368_s25] sm:$0xff]  ;;  %vm653_vm2 = vcmask 261120   ;;  %s688_s3 = sshll.u32 %s1681_s1, 4  ;;  %s689_s3 = int_to_ptr.vmem [resolvable:$true] %s688_s3 }
 0x242   : > { %s1859_s0 = sld [smem:[#allocation21_spill]]  ;;  %663 = vmatpush.bf16.msra.mxu0 %v895_v16  ;;  %v1082_v20 = vld [vmem:[%s411_s30] ss:$0 sm:$0xff] }
 0x243   : > { %s1860_s20 = sld [smem:[#allocation19_spill]] }
 0x244   : > { %s1863_s25 = sld [smem:[#allocation36_spill]] }
 0x246   : > { %664 = vmatpush.bf16.msra.mxu0 %v894_v17 }
 0x247   : > { %v893_v19 = vld [vmem:[#allocation2] sm:$0xff]  ;;  %s896_s10 = sshll.u32 %s1858_s21, 2 }
 0x248   : > { %s685_s22 = sadd.s32 %s1859_s0, %s896_s10 }
 0x249   : > { %882 = vmatmul.msk.bf16.vlgmr.msra.gmra.mxu0 %vm653_vm2, %v893_v19  ;;  %s886_s27 = sshll.u32 %s685_s22, 3  ;;  %s1865_s21 = sand.u32 1, %s1860_s20  }
 0x24a   : > { %s1864_s2 = smov %s1863_s25  ;;  %s687_s24 = scalar_lea.hbm %s1863_s25, %s886_s27 }
 0x24b   : > { %s690_s4 = sshll.u32 %s687_s24, 4  ;;  %s674_s0 = scalar_lea.sflag [#allocation5], %s1865_s21  ;;  %s691_s4 = int_to_ptr.hbm [resolvable:$true] %s690_s4 }
 0x24c   : > { %s1247_s16 = sshra.s32 %s691_s4, 4  ;;  %s1253_s17 = scalar_lea.hbm %s1864_s2, 64  ;;  %s1248_s16 = int_to_ptr.hbm [resolvable:$true] %s1247_s16 }
 0x24d   : > { %s1249_s30 = scalar_lea.hbm %s1248_s16, 16  ;;  %p1254_p1 = scmp.lt.s32.totalorder %s1248_s16, %s1864_s2 }
 0x24e   : > { %p1250_p4 = scmp.ne.s32.totalorder %s1248_s16, %s1249_s30  ;;  %p1255_p2 = scmp.lt.s32.totalorder %s1253_s17, %s1249_s30 }
 0x250   : > { %p1251_p9 = pnand %p1250_p4, %p1529_p6  ;;  %p1256_p7 = por %p1255_p2, %p1254_p1 }
 0x252   : > { %p1252_p12 = pneg %p1251_p9 }
 0x254   : > { %p1257_p3 = pnand %p1256_p7, %p1252_p12 }
 0x2c6   : > { %v666_v22 = vpop.f32.mrf.mxu0 }
 0x2c7   : > { %v667_v23 = vadd.f32 %v1082_v20, %v666_v22 }
 0x2c9   : > { %671 = vst [vmem:[%s1681_s1] sm:$0xff] %v667_v23 }
 0x2ce   : > { %v668_v13 = vpop.f32.mrf.mxu0 }
 0x2cf   : > { %v669_v24 = vadd.f32 %v1082_v20, %v668_v13 }
 0x2d1   : > { %672 = vst [vmem:[%s1681_s1 + $0x8] sm:$0xff] %v669_v24 }
 0x2d2   : > { %1260 = shalt.err (!%p1257_p3)
}
 0x2d3   : > { %s1401_s1 = smov 128   ;;  %s1402_s20 = smov 256  }
 0x2d4   : > { %s1403_s27 = smov 8  }
 0x2d5   : > { %913 = dma.vmem_to_hbm [thread:$0]  (%p1529_p6), %s689_s3, 256, %s691_s4, %s674_s0, %s1401_s1, %s1402_s20, %s1403_s27  }
 0x2d6 PF: > { %s1866_s7 = sld [smem:[#allocation18_spill]]  ;;  %p943_p5 = scmp.ge.s32.totalorder %s1391_s14, 2 }
 0x2d8   : > { %p933_p8 = pnand %p943_p5, %p1535_p10 }
 0x2da   : > { %p934_p13 = pneg %p933_p8 }
 0x2dc   : > { %s705_s25 = sand.u32 1, %s1866_s7  }
 0x2dd   : > { %s706_s24 = scalar_lea.sflag [#allocation5], %s705_s25 }
 0x2de   : > { %1334 = dma.done.wait (%p934_p13), %s706_s24, 256  }
 0x2df   : > { %1336 = vsyncadd (%p934_p13), %s706_s24, 4294967040  ;;  %s25_s14 = sadd.s32 1, %s1391_s14   ;;  %s1869_s24 = sld [smem:[#allocation19_spill]] }
 0x2e0   : > { %p1739_p11 = scmp.ge.s32.totalorder %s25_s14, 6   ;;  %s1870_s30 = sld [smem:[#allocation20_spill]] }
 0x2e1   : > { %s1871_s3 = sld [smem:[#allocation27_spill]]  ;;  %s1873_s25 = smov %s1347_s26 }
 0x2e2   : > { %s1872_s4 = sld [smem:[#allocation29_spill]]  ;;  %s1874_s26 = smov %s1599_s11 }
 0x2e3   : > { %s1875_s27 = smov %s1355_s28  ;;  %s1876_s28 = smov %s1359_s29 }
 0x2e4   : > { %s1877_s29 = smov %s1630_s8  ;;  %s1878_s8 = smov %s1371_s9 }
 0x2e5   : > { %s1879_s9 = smov %s1596_s18  ;;  %s1880_s10 = smov %s1383_s12 }
 0x2e6   : > { %s1881_s11 = smov %s1387_s13  ;;  %24 = sbr.rel (!%p1739_p11) target bundleno = 20 (0x14), region = 123 }
 0x2e7   : > { %s1882_s12 = smov %s1871_s3 }
 0x2e8   : > { %s1883_s13 = smov %s1872_s4 }
 0x2eb   :  { %712 = vsyncpa [#allocation4], 1 }
 0x2ec   :  { %714 = vsyncpa [#allocation4 + $0x1], 1 }
 0x2ed   :  { %715 = vsyncpa [#allocation7], 1 }
 0x2ee   :  { %716 = vsyncpa [#allocation10], 1 }
 0x2ef   :  { %717 = vsyncpa [#allocation5], 1 }
 0x2f0   :  { %719 = vsyncpa [#allocation5 + $0x1], 1 }

</bundles_post_ra>
